<compile_context>
chip_gen: v5e
topology: v5e:2x2
jax: 0.10.0
libtpu: 0.0.40
codegen_flags: <defaults>
</compile_context>

<pallas_src>
import functools

import jax
import jax.numpy as jnp
from jax import lax
from jax.experimental import pallas as pl
from jax.experimental.pallas import tpu as pltpu

GAMMA = 0.5  # module default; gamma=0.5 lets us use sqrt instead of power()


def _focal_loss_kernel(logits_ref, target_ref, out_ref, *, n_total):
    # logits_ref: (TM, C) input dtype; target_ref: (TM, 1) i32;
    # out_ref: (TM, 1) f32 per-row focal NLL (0 for padded rows).
    i = pl.program_id(0)
    x = logits_ref[...].astype(jnp.float32)                 # (TM, C)
    tm, c = x.shape

    # Validity mask for the (possibly partial) last tile.
    row_ids = i * tm + lax.broadcasted_iota(jnp.int32, (tm, 1), 0)
    valid = row_ids < n_total                                # (TM, 1)

    # log-sum-exp pieces, per row (the only full-width work needed).
    m = jnp.max(x, axis=-1, keepdims=True)                   # (TM, 1)
    lse = jnp.log(jnp.sum(jnp.exp(x - m), axis=-1, keepdims=True))  # (TM, 1)

    # Gather the target logit via a one-hot mask -- no (TM, C) log_prob/prob.
    col_ids = lax.broadcasted_iota(jnp.int32, (tm, c), 1)
    one_hot = col_ids == target_ref[...]                     # (TM, C)
    picked_logit = jnp.sum(jnp.where(one_hot, x, 0.0), axis=-1, keepdims=True)

    # Focal NLL on the (TM, 1) picked vector only.
    picked_logp = picked_logit - m - lse                     # log p_target <= 0
    picked_p = jnp.exp(picked_logp)
    focal = jnp.sqrt(jnp.maximum(1.0 - picked_p, 0.0)) * picked_logp

    # Padded rows (garbage logits/targets) are zeroed here; the true N is the
    # divisor in the wrapper, so the mean stays exact for N % TM != 0.
    out_ref[...] = jnp.where(valid, -focal, 0.0)


def _default_block_rows(n, c, itemsize):
    # Size the tile on the lane-padded footprint (C rounds up to 128 lanes);
    # keep the double-buffered logits stream around ~24 MiB so the whole
    # pipeline fits comfortably on every generation (v7x: 64 MiB physical).
    c_pad = pl.cdiv(c, 128) * 128
    budget_bytes = 24 * 1024 * 1024
    tm = budget_bytes // (2 * c_pad * itemsize)
    tm = max(8, min(1024, (tm // 8) * 8))
    tm = min(tm, pl.cdiv(n, 8) * 8)          # no point exceeding (padded) N
    return int(tm)


def focal_loss(logits, targets, *, block_rows=None):
    """logits: (N, C) float (f32 or bf16), targets: (N,) int -> scalar f32."""
    n, c = logits.shape
    targets2d = targets.astype(jnp.int32).reshape(n, 1)

    tm = block_rows if block_rows is not None else _default_block_rows(
        n, c, jnp.dtype(logits.dtype).itemsize)
    grid = (pl.cdiv(n, tm),)

    per_row = pl.pallas_call(
        functools.partial(_focal_loss_kernel, n_total=n),
        out_shape=jax.ShapeDtypeStruct((n, 1), jnp.float32),
        grid_spec=pltpu.PrefetchScalarGridSpec(
            num_scalar_prefetch=0,
            grid=grid,
            in_specs=[
                pl.BlockSpec((tm, c), lambda i: (i, 0)),   # logits (input dtype)
                pl.BlockSpec((tm, 1), lambda i: (i, 0)),   # targets (int32)
            ],
            out_specs=pl.BlockSpec((tm, 1), lambda i: (i, 0)),
        ),
        compiler_params=pltpu.CompilerParams(
            dimension_semantics=("parallel",),
            vmem_limit_bytes=48 * 1024 * 1024,
        ),
    )(logits, targets2d)

    # reduction='mean', weight=None: tiny (N, 1) -> scalar reduce in plain JAX.
    # TODO(synk): per-class `weight` and 'sum'/'none' reductions not wired up
    # (module defaults are weight=None, reduction='mean'); vocab-scale C would
    # additionally want an online-LSE grid axis over the class dimension.
    return jnp.sum(per_row) / jnp.float32(n)


def _focal_loss_ref(logits, targets, gamma=GAMMA):
    # Plain-JAX reference for sanity checking.
    logits = logits.astype(jnp.float32)
    logp = jax.nn.log_softmax(logits, axis=-1)
    p = jnp.exp(logp)
    focal = jnp.power(jnp.maximum(1.0 - p, 0.0), gamma) * logp
    picked = jnp.take_along_axis(focal, targets[:, None], axis=-1)[:, 0]
    return -jnp.mean(picked)


if __name__ == "__main__":
    key = jax.random.PRNGKey(0)
    k_logits, k_tgt = jax.random.split(key)

    N, C = 20, 32  # N deliberately not a multiple of the block to test masking
    logits = jax.random.normal(k_logits, (N, C), dtype=jnp.float32)
    targets = jax.random.randint(k_tgt, (N,), 0, C, dtype=jnp.int32)

    # Small explicit tile -> grid of 3 steps with a partial last tile.
    loss = jax.block_until_ready(focal_loss(logits, targets, block_rows=8))
    ref = jax.block_until_ready(_focal_loss_ref(logits, targets))
    assert jnp.allclose(loss, ref, atol=1e-5, rtol=1e-5), (loss, ref)

    # Auto-sized tile path (single tile here).
    loss_auto = jax.block_until_ready(focal_loss(logits, targets))
    assert jnp.allclose(loss_auto, ref, atol=1e-5, rtol=1e-5), (loss_auto, ref)

    # bf16 logits stay bf16 through the DMA; compute is f32 inside the kernel.
    logits_bf16 = logits.astype(jnp.bfloat16)
    loss_bf16 = jax.block_until_ready(
        focal_loss(logits_bf16, targets, block_rows=8))
    ref_bf16 = jax.block_until_ready(_focal_loss_ref(logits_bf16, targets))
    assert jnp.allclose(loss_bf16, ref_bf16, atol=1e-4, rtol=1e-4), (
        loss_bf16, ref_bf16)

    print("KERNEL_OK")
</pallas_src>

<mosaic_0001>
module attributes {stable_mosaic.version = 11 : i64} {
  func.func @_focal_loss_kernel(%arg0: i32, %arg1: memref<8x32xf32, #tpu.memory_space<vmem>>, %arg2: memref<8x1xi32, #tpu.memory_space<vmem>>, %arg3: memref<8x1xf32, #tpu.memory_space<vmem>>) attributes {dimension_semantics = [#tpu.dimension_semantics<parallel>], iteration_bounds = array<i64: 3>, scalar_prefetch = 0 : i64, scratch_operands = 0 : i64, tpu.core_type = #tpu.core_type<tc>, window_params = [{transform_indices = @transform_0, window_bounds = array<i64: 8, 32>}, {transform_indices = @transform_1, window_bounds = array<i64: 8, 1>}, {transform_indices = @transform_2, window_bounds = array<i64: 8, 1>}]} {
    %c0 = arith.constant 0 : index
    %c0_0 = arith.constant 0 : index
    %0 = vector.load %arg1[%c0, %c0_0] : memref<8x32xf32, #tpu.memory_space<vmem>>, vector<8x32xf32>
    %c8_i32 = arith.constant 8 : i32
    %1 = arith.muli %arg0, %c8_i32 : i32
    %2 = tpu.iota {dimensions = array<i32: 0>} : vector<8x1xi32>
    %3 = vector.broadcast %1 : i32 to vector<8x1xi32>
    %4 = arith.addi %3, %2 : vector<8x1xi32>
    %c20_i32 = arith.constant 20 : i32
    %5 = vector.broadcast %c20_i32 : i32 to vector<8x1xi32>
    %6 = arith.cmpi slt, %4, %5 : vector<8x1xi32>
    %cst = arith.constant dense<0xFF800000> : vector<8xf32>
    %7 = vector.multi_reduction <maximumf>, %0, %cst [1] : vector<8x32xf32> to vector<8xf32>
    %8 = vector.shape_cast %7 : vector<8xf32> to vector<8x1xf32>
    %9 = vector.broadcast %8 : vector<8x1xf32> to vector<8x32xf32>
    %10 = arith.subf %0, %9 : vector<8x32xf32>
    %11 = math.exp %10 : vector<8x32xf32>
    %cst_1 = arith.constant dense<0.000000e+00> : vector<8xf32>
    %12 = vector.multi_reduction <add>, %11, %cst_1 [1] : vector<8x32xf32> to vector<8xf32>
    %13 = vector.shape_cast %12 : vector<8xf32> to vector<8x1xf32>
    %14 = math.log %13 : vector<8x1xf32>
    %15 = tpu.iota {dimensions = array<i32: 1>} : vector<8x32xi32>
    %c0_2 = arith.constant 0 : index
    %c0_3 = arith.constant 0 : index
    %16 = vector.load %arg2[%c0_2, %c0_3] : memref<8x1xi32, #tpu.memory_space<vmem>>, vector<8x1xi32>
    %17 = vector.broadcast %16 : vector<8x1xi32> to vector<8x32xi32>
    %18 = arith.cmpi eq, %15, %17 : vector<8x32xi32>
    %cst_4 = arith.constant 0.000000e+00 : f32
    %19 = vector.broadcast %cst_4 : f32 to vector<8x32xf32>
    %20 = arith.select %18, %0, %19 : vector<8x32xi1>, vector<8x32xf32>
    %cst_5 = arith.constant dense<0.000000e+00> : vector<8xf32>
    %21 = vector.multi_reduction <add>, %20, %cst_5 [1] : vector<8x32xf32> to vector<8xf32>
    %22 = vector.shape_cast %21 : vector<8xf32> to vector<8x1xf32>
    %23 = arith.subf %22, %8 : vector<8x1xf32>
    %24 = arith.subf %23, %14 : vector<8x1xf32>
    %25 = math.exp %24 : vector<8x1xf32>
    %cst_6 = arith.constant 1.000000e+00 : f32
    %26 = vector.broadcast %cst_6 : f32 to vector<8x1xf32>
    %27 = arith.subf %26, %25 : vector<8x1xf32>
    %cst_7 = arith.constant 0.000000e+00 : f32
    %28 = vector.broadcast %cst_7 : f32 to vector<8x1xf32>
    %29 = arith.maximumf %27, %28 : vector<8x1xf32>
    %30 = math.sqrt %29 : vector<8x1xf32>
    %31 = arith.mulf %30, %24 : vector<8x1xf32>
    %cst_8 = arith.constant 0.000000e+00 : f32
    %32 = vector.broadcast %cst_8 : f32 to vector<8x1xf32>
    %33 = arith.subf %32, %31 : vector<8x1xf32>
    %cst_9 = arith.constant 0.000000e+00 : f32
    %34 = vector.broadcast %cst_9 : f32 to vector<8x1xf32>
    %35 = arith.select %6, %33, %34 : vector<8x1xi1>, vector<8x1xf32>
    %c0_10 = arith.constant 0 : index
    %c0_11 = arith.constant 0 : index
    %36 = vector.load %arg3[%c0_10, %c0_11] : memref<8x1xf32, #tpu.memory_space<vmem>>, vector<8x1xf32>
    tpu.vector_store %arg3[%c0_10, %c0_11], %35 {strides = array<i32>} : memref<8x1xf32, #tpu.memory_space<vmem>>, vector<8x1xf32>,
    return
  }
  func.func @transform_0(%arg0: i32) -> (i32, i32) {
    %c0_i32 = arith.constant 0 : i32
    %c0_i32_0 = arith.constant 0 : i32
    return %arg0, %c0_i32 : i32, i32
  }
  func.func @transform_1(%arg0: i32) -> (i32, i32) {
    %c0_i32 = arith.constant 0 : i32
    %c0_i32_0 = arith.constant 0 : i32
    return %arg0, %c0_i32 : i32, i32
  }
  func.func @transform_2(%arg0: i32) -> (i32, i32) {
    %c0_i32 = arith.constant 0 : i32
    %c0_i32_0 = arith.constant 0 : i32
    return %arg0, %c0_i32 : i32, i32
  }
}

</mosaic_0001>

<bundles_post_ra>
// kernel: tpu_custom_call.1
= control target key start
LH: loop header
LB: loop body
LE: loop exit
PB: predicated region body
PF: predicated region fallthrough
CT: control target
= control target key end

     0   :  { %s327_s9 = smov 0   ;;  %s360_s0 = inlined_call_operand.vmem [shape: f32[20,32], index: 0, kind: input, shape index: {}]   ;;  %s361_s1 = inlined_call_operand.vmem [shape: s32[20,1], index: 1, kind: input, shape index: {}]   ;;  %s362_s2 = inlined_call_operand.vmem [shape: f32[20,1], index: 2, kind: output, shape index: {}]  }
   0x1 LB: > { %s333_s10 = sadd.s32 4294967295, %s309_s9   ;;  %p278_p0 = scmp.ge.s32.totalorder %s309_s9, 1  ;;  %s309_s9 = sphi %s327_s9, %s12_s9  }
   0x2   : > { %p120_p1 = scmp.lt.s32.totalorder %s309_s9, 4 }
   0x4   : > { %p121_p2 = pnand %p278_p0, %p120_p1 }
   0x5   : > { %p144_p3 = scmp.lt.s32.totalorder (!%p121_p2), %s333_s10, 2  ;;  %s282_s19 = sshll.u32 (!%p121_p2), %s333_s10, 3 }
   0x6   : > { %124 = sbr.rel (%p121_p2) target bundleno = 315 (0x13b), region = 28 }
   0xb   : > { %v311_v0 = vmov 0   ;;  %s145_s11 = scalar_select %p144_p3, %s333_s10, 2  ;;  %vm163_vm0 = vcmask 261120   ;;  %v158_v9 = vlaneseq  ;;  %v160_v30 = vstv %s282_s19 }
   0xc   : > { %294 = vset.pattern.permute.xlu0 %v311_v0  ;;  %vm207_vm5 = vcmask 7168  }
   0xd   : > { %s339_s12 = sshll.u32 %s145_s11, 3  ;;  %v176_v10 = vand.u32 127, %v158_v9  ;;  %v159_v29 = vshrl.u32 %v158_v9, 7 }
   0xe   : > { %s147_s15 = scalar_lea.vmem %s360_s0, %s339_s12  ;;  %s151_s18 = scalar_lea.vmem %s361_s1, %s339_s12 }
   0xf   : > { %v156_v1 = vld [vmem:[%s147_s15] sm:$0xff]  ;;  %v161_v33 = vadd.s32 %v160_v30, %v159_v29  ;;  %s155_s22 = scalar_lea.vmem %s362_s2, %s339_s12 }
  0x10   : > { %v164_v2 = vsel %vm163_vm0, %v156_v1, -inf  ;;  %v177_v3 = vld [vmem:[%s151_s18] sm:$0xff] }
  0x11   : > { %165 = vmax.xlane.f32.xlu0 %v164_v2  ;;  %vm162_vm4 = vcmp.lt.s32.totalorder %v161_v33, 20 }
  0x25   : > { %179 = vperm.xlu0 %294, %v177_v3  }
  0x84   : > { %v166_v4 = vpop.xlane.xlu0 %165 }
  0x85   : > { %v167_v5 = vsub.f32 %v156_v1, %v166_v4 }
  0x87   : > { %v168_v6 = vmul.f32 1.442695, %v167_v5 }
  0x89   : > { %295 = vpow2.f32 %v168_v6 }
  0x8f   : > { %v296_v7 = vpop.eup %295 }
  0x90   : > { %v170_v8 = vsel %vm163_vm0, %v296_v7, 0.0 }
  0x91   : > { %171 = vadd.xlane.f32.xlu1 %v170_v8 }
  0x97   : > { %v180_v11 = vpop.permute.xlu0 %179 }
  0x98   : > { %vm181_vm1 = vcmp.eq.s32.totalorder %v176_v10, %v180_v11 }
  0x99   : > { %v182_v12 = vsel %vm181_vm1, %v156_v1, 0.0 }
  0x9a   : > { %v183_v13 = vsel %vm163_vm0, %v182_v12, 0.0 }
  0x9b   : > { %184 = vadd.xlane.f32.xlu1 %v183_v13 }
 0x104   : > { %v172_v14 = vpop.xlane.xlu1 %171 }
 0x105   : > { %297 = vlog2.f32 %v172_v14 }
 0x10b   : > { %v298_v15 = vpop.eup %297 }
 0x10c   : > { %v174_v17 = vmul.f32 0.6931472, %v298_v15 }
 0x10e   : > { %v185_v16 = vpop.xlane.xlu1 %184 }
 0x10f   : > { %v186_v18 = vsub.f32 %v185_v16, %v166_v4 }
 0x111   : > { %v187_v19 = vsub.f32 %v186_v18, %v174_v17 }
 0x113   : > { %v188_v20 = vmul.f32 1.442695, %v187_v19 }
 0x115   : > { %299 = vpow2.f32 %v188_v20 }
 0x11b   : > { %v300_v21 = vpop.eup %299 }
 0x11c   : > { %v190_v22 = vsub.f32 1.0, %v300_v21 }
 0x11e   : > { %v191_v23 = vmax.f32 %v190_v22, 0.0 }
 0x120   : > { %301 = vrsqrt.f32 %v191_v23  ;;  %vm199_vm2 = vcmp.eq.f32.partialorder %v191_v23, inf  ;;  %v202_v34 = vand.u32 2147483648, %v191_v23  ;;  %vm201_vm3 = vcmp.eq.f32.partialorder %v191_v23, 0.0 }
 0x126   : > { %v302_v24 = vpop.eup %301 }
 0x127   : > { %v193_v25 = vmul.f32 %v302_v24, %v191_v23 }
 0x129   : > { %v194_v26 = vmul.f32 %v302_v24, %v193_v25 }
 0x12b   : > { %v195_v27 = vmul.f32 0.5, %v194_v26 }
 0x12d   : > { %v196_v28 = vsub.f32 1.5, %v195_v27 }
 0x12f   : > { %v197_v31 = vmul.f32 %v302_v24, %v196_v28 }
 0x131   : > { %v198_v32 = vmul.f32 %v197_v31, %v191_v23 }
 0x133   : > { %v200_v35 = vsel %vm199_vm2, %v191_v23, %v198_v32 }
 0x134   : > { %v203_v36 = vsel %vm201_vm3, %v202_v34, %v200_v35 }
 0x135   : > { %v204_v37 = vmul.f32 %v203_v36, %v187_v19 }
 0x137   : > { %v205_v38 = vsub.f32 0.0, %v204_v37 }
 0x139   : > { %v206_v39 = vsel %vm162_vm4, %v205_v38, 0.0 }
 0x13a   : > { %208 = vst.msk [vmem:[%s155_s22] sm:$0xff] %vm207_vm5, %v206_v39 }
 0x13b PF: > { %s12_s9 = sadd.s32 1, %s309_s9  }
 0x13c   : > { %p9_p4 = scmp.ge.s32.totalorder %s12_s9, 5  }
 0x13e   :  { %11 = sbr.rel (!%p9_p4) target bundleno = 1 (0x1), region = 61 }

</bundles_post_ra>
